<compile_context>
chip_gen: v5e
topology: v5e:2x2
jax: 0.10.0
libtpu: 0.0.40
codegen_flags: <defaults>
</compile_context>

<pallas_src>
import jax
import jax.numpy as jnp
from jax.experimental import pallas as pl
from jax.experimental.pallas import tpu as pltpu

HIDDEN = 100       # logical hidden width (torch.nn.Linear(n_feature, 100))
HIDDEN_P = 128     # lane-padded hidden width (keep at 128; do NOT pad to 256)
SUBLANE = 8
MAX_TILE_B = 2048  # streaming tiles >= 512 rows are ~85%+ of HBM roofline


def _round_up(x, m):
    return ((x + m - 1) // m) * m


def mlp_kernel(x_ref, w1_ref, b1_ref, w2_ref, b2_ref, o_ref):
    # hidden = relu(x @ W1 + b1); hidden lanes padded to 128 -> dense vregs.
    h = jnp.dot(x_ref[...], w1_ref[...], preferred_element_type=jnp.float32)
    h = jnp.maximum(h + b1_ref[...], 0.0)            # bias + ReLU on the VPU
    # out = hidden @ W2 + b2  -> written straight at (tile_b, n_out)
    o = jnp.dot(h, w2_ref[...], preferred_element_type=jnp.float32)
    o_ref[...] = (o + b2_ref[...]).astype(o_ref.dtype)


def prepare_params(w1, b1, w2, b2):
    """One-time padding of the hidden dim 100 -> 128.  Call at init, NOT per
    forward (keeps the per-call path free of extra XLA launches / HBM passes).
    w1: (n_feature, 100); b1: (100,) or (1, 100); w2: (100, n_out);
    b2: (n_out,) or (1, n_out).  Returns padded (w1p, b1p, w2p, b2p).
    """
    F = w1.shape[0]
    n_out = w2.shape[1]
    b1 = jnp.asarray(b1, jnp.float32).reshape(1, -1)
    b2 = jnp.asarray(b2, jnp.float32).reshape(1, -1)
    w1p = jnp.zeros((F, HIDDEN_P), jnp.float32).at[:, :HIDDEN].set(w1)
    b1p = jnp.zeros((1, HIDDEN_P), jnp.float32).at[:, :HIDDEN].set(b1)
    w2p = jnp.zeros((HIDDEN_P, n_out), jnp.float32).at[:HIDDEN, :].set(w2)
    b2p = b2
    # TODO(synk): if tolerance allows, also cast w1p/w2p to bf16 here (keep
    # f32 accumulation in the kernel) to halve weight VMEM/HBM footprint.
    return w1p, b1p, w2p, b2p


def _vmem_capacity_bytes():
    try:
        return int(pltpu.get_tpu_info().vmem_capacity_bytes)
    except Exception:
        return 64 << 20  # conservative (v7x per-TC) fallback


def _choose_tile_b(B, F, n_out, budget_bytes):
    """Largest batch tile (multiple of 8, <= MAX_TILE_B, <= B rounded up)
    whose double-buffered x/out blocks + resident weights + h scratch fit the
    VMEM budget."""
    # weights & biases (double-buffered by the default pipeline)
    fixed = 4 * 2 * (F * HIDDEN_P + HIDDEN_P + HIDDEN_P * n_out + n_out)
    # per batch-row: x + out double-buffered, plus the f32 hidden intermediate
    per_row = 4 * (2 * F + 2 * n_out + HIDDEN_P)
    avail = budget_bytes - fixed
    if avail < per_row * SUBLANE:
        # TODO(synk): for huge F the resident W1 alone nearly fills VMEM; add
        # a K(F) grid axis with a pl.when-init f32 accumulator instead of
        # shrinking tile_b further.
        tile_b = SUBLANE
    else:
        tile_b = (avail // per_row) // SUBLANE * SUBLANE
    return max(SUBLANE, min(tile_b, MAX_TILE_B, _round_up(B, SUBLANE)))


def network_forward(x, w1p, b1p, w2p, b2p):
    """x: (B, n_feature) f32; padded params from prepare_params().
    Returns (B, n_out) f32 == relu(x @ W1 + b1) @ W2 + b2."""
    B, F = x.shape
    n_out = w2p.shape[1]

    vmem_cap = _vmem_capacity_bytes()
    budget = (vmem_cap * 3) // 4                      # leave compiler headroom
    tile_b = _choose_tile_b(B, F, n_out, budget)
    grid = (pl.cdiv(B, tile_b),)                      # ragged last block is OK:
                                                      # rows are independent.

    # Scoped-VMEM request: actual footprint + margin, capped below physical.
    est = 4 * (2 * tile_b * (F + n_out) + tile_b * HIDDEN_P
               + 2 * (F * HIDDEN_P + HIDDEN_P + HIDDEN_P * n_out + n_out))
    vmem_limit = int(min(max(est + (2 << 20), 4 << 20), vmem_cap - (8 << 20)))

    # TODO(synk): once pipeline_mode=pl.Buffered(1) is confirmed supported in
    # the deployed toolchain, single-buffer the resident W/b BlockSpecs to
    # halve their VMEM footprint on v7x (they never change block index).
    return pl.pallas_call(
        mlp_kernel,
        out_shape=jax.ShapeDtypeStruct((B, n_out), jnp.float32),
        grid_spec=pltpu.PrefetchScalarGridSpec(
            num_scalar_prefetch=0,
            grid=grid,
            in_specs=[
                pl.BlockSpec((tile_b, F), lambda i: (i, 0)),          # x: batch-tiled
                pl.BlockSpec((F, HIDDEN_P), lambda i: (0, 0)),        # W1: resident
                pl.BlockSpec((1, HIDDEN_P), lambda i: (0, 0)),        # b1: resident
                pl.BlockSpec((HIDDEN_P, n_out), lambda i: (0, 0)),    # W2: resident
                pl.BlockSpec((1, n_out), lambda i: (0, 0)),           # b2: resident
            ],
            out_specs=pl.BlockSpec((tile_b, n_out), lambda i: (i, 0)),
        ),
        compiler_params=pltpu.CompilerParams(
            dimension_semantics=("parallel",),    # megacore shard on v7x
            vmem_limit_bytes=vmem_limit,
        ),
    )(x, w1p, b1p, w2p, b2p)


def init_params(key, n_feature, n_out):
    """Deterministic synthetic init matching PyTorch Linear shapes
    (uniform in +/- 1/sqrt(fan_in), like torch.nn.Linear's default).
    Stored as (in, out) == PyTorch weight.T so the kernel matmuls directly."""
    k1, k2, k3, k4 = jax.random.split(key, 4)
    lim1 = 1.0 / jnp.sqrt(jnp.float32(n_feature))
    lim2 = 1.0 / jnp.sqrt(jnp.float32(HIDDEN))
    w1 = jax.random.uniform(k1, (n_feature, HIDDEN), jnp.float32, -lim1, lim1)
    b1 = jax.random.uniform(k2, (1, HIDDEN), jnp.float32, -lim1, lim1)
    w2 = jax.random.uniform(k3, (HIDDEN, n_out), jnp.float32, -lim2, lim2)
    b2 = jax.random.uniform(k4, (1, n_out), jnp.float32, -lim2, lim2)
    return w1, b1, w2, b2


if __name__ == "__main__":
    key = jax.random.PRNGKey(0)
    k_x, k_p = jax.random.split(key)

    batch, n_feature, n_out = 8, 32, 4
    x = jax.random.normal(k_x, (batch, n_feature), jnp.float32)
    w1, b1, w2, b2 = init_params(k_p, n_feature, n_out)

    # One-time parameter prep (hidden 100 -> 128 padding), outside the
    # per-call path.
    w1p, b1p, w2p, b2p = prepare_params(w1, b1, w2, b2)

    out = network_forward(x, w1p, b1p, w2p, b2p)
    out = jax.block_until_ready(out)

    # Reference check in plain JAX (same math as the PyTorch forward).
    ref = jnp.maximum(x @ w1 + b1, 0.0) @ w2 + b2
    assert out.shape == (batch, n_out)
    assert jnp.allclose(out, ref, atol=1e-5, rtol=1e-5)

    print("KERNEL_OK")
</pallas_src>

<mosaic_0001>
module attributes {stable_mosaic.version = 11 : i64} {
  func.func @mlp_kernel(%arg0: i32, %arg1: memref<8x32xf32, #tpu.memory_space<vmem>>, %arg2: memref<32x128xf32, #tpu.memory_space<vmem>>, %arg3: memref<1x128xf32, #tpu.memory_space<vmem>>, %arg4: memref<128x4xf32, #tpu.memory_space<vmem>>, %arg5: memref<1x4xf32, #tpu.memory_space<vmem>>, %arg6: memref<8x4xf32, #tpu.memory_space<vmem>>) attributes {dimension_semantics = [#tpu.dimension_semantics<parallel>], iteration_bounds = array<i64: 1>, scalar_prefetch = 0 : i64, scratch_operands = 0 : i64, tpu.core_type = #tpu.core_type<tc>, window_params = [{transform_indices = @transform_0, window_bounds = array<i64: 8, 32>}, {pipeline_mode = #tpu.pipeline_mode<synchronous>, transform_indices = @transform_1, window_bounds = array<i64: 32, 128>}, {pipeline_mode = #tpu.pipeline_mode<synchronous>, transform_indices = @transform_2, window_bounds = array<i64: 1, 128>}, {pipeline_mode = #tpu.pipeline_mode<synchronous>, transform_indices = @transform_3, window_bounds = array<i64: 128, 4>}, {pipeline_mode = #tpu.pipeline_mode<synchronous>, transform_indices = @transform_4, window_bounds = array<i64: 1, 4>}, {transform_indices = @transform_5, window_bounds = array<i64: 8, 4>}]} {
    %c0 = arith.constant 0 : index
    %c0_0 = arith.constant 0 : index
    %0 = vector.load %arg1[%c0, %c0_0] : memref<8x32xf32, #tpu.memory_space<vmem>>, vector<8x32xf32>
    %c0_1 = arith.constant 0 : index
    %c0_2 = arith.constant 0 : index
    %1 = vector.load %arg2[%c0_1, %c0_2] : memref<32x128xf32, #tpu.memory_space<vmem>>, vector<32x128xf32>
    %cst = arith.constant dense<0.000000e+00> : vector<8x128xf32>
    %2 = tpu.matmul %0, %1, %cst {dimension_numbers = #tpu.dot_dimension_numbers<[1], [0], [0], [1], [0, 0, 1, 1], [], []>} : vector<8x32xf32>, vector<32x128xf32>, vector<8x128xf32> -> vector<8x128xf32>
    %c0_3 = arith.constant 0 : index
    %c0_4 = arith.constant 0 : index
    %3 = vector.load %arg3[%c0_3, %c0_4] : memref<1x128xf32, #tpu.memory_space<vmem>>, vector<1x128xf32>
    %4 = vector.broadcast %3 : vector<1x128xf32> to vector<8x128xf32>
    %5 = arith.addf %2, %4 : vector<8x128xf32>
    %cst_5 = arith.constant 0.000000e+00 : f32
    %6 = vector.broadcast %cst_5 : f32 to vector<8x128xf32>
    %7 = arith.maximumf %5, %6 : vector<8x128xf32>
    %c0_6 = arith.constant 0 : index
    %c0_7 = arith.constant 0 : index
    %8 = vector.load %arg4[%c0_6, %c0_7] : memref<128x4xf32, #tpu.memory_space<vmem>>, vector<128x4xf32>
    %cst_8 = arith.constant dense<0.000000e+00> : vector<8x4xf32>
    %9 = tpu.matmul %7, %8, %cst_8 {dimension_numbers = #tpu.dot_dimension_numbers<[1], [0], [0], [1], [0, 0, 1, 1], [], []>} : vector<8x128xf32>, vector<128x4xf32>, vector<8x4xf32> -> vector<8x4xf32>
    %c0_9 = arith.constant 0 : index
    %c0_10 = arith.constant 0 : index
    %10 = vector.load %arg5[%c0_9, %c0_10] : memref<1x4xf32, #tpu.memory_space<vmem>>, vector<1x4xf32>
    %11 = vector.broadcast %10 : vector<1x4xf32> to vector<8x4xf32>
    %12 = arith.addf %9, %11 : vector<8x4xf32>
    %c0_11 = arith.constant 0 : index
    %c0_12 = arith.constant 0 : index
    %13 = vector.load %arg6[%c0_11, %c0_12] : memref<8x4xf32, #tpu.memory_space<vmem>>, vector<8x4xf32>
    tpu.vector_store %arg6[%c0_11, %c0_12], %12 {strides = array<i32>} : memref<8x4xf32, #tpu.memory_space<vmem>>, vector<8x4xf32>,
    return
  }
  func.func @transform_0(%arg0: i32) -> (i32, i32) {
    %c0_i32 = arith.constant 0 : i32
    %c0_i32_0 = arith.constant 0 : i32
    return %arg0, %c0_i32 : i32, i32
  }
  func.func @transform_1(%arg0: i32) -> (i32, i32) {
    %c0_i32 = arith.constant 0 : i32
    %c0_i32_0 = arith.constant 0 : i32
    %c0_i32_1 = arith.constant 0 : i32
    return %c0_i32, %c0_i32_0 : i32, i32
  }
  func.func @transform_2(%arg0: i32) -> (i32, i32) {
    %c0_i32 = arith.constant 0 : i32
    %c0_i32_0 = arith.constant 0 : i32
    %c0_i32_1 = arith.constant 0 : i32
    return %c0_i32, %c0_i32_0 : i32, i32
  }
  func.func @transform_3(%arg0: i32) -> (i32, i32) {
    %c0_i32 = arith.constant 0 : i32
    %c0_i32_0 = arith.constant 0 : i32
    %c0_i32_1 = arith.constant 0 : i32
    return %c0_i32, %c0_i32_0 : i32, i32
  }
  func.func @transform_4(%arg0: i32) -> (i32, i32) {
    %c0_i32 = arith.constant 0 : i32
    %c0_i32_0 = arith.constant 0 : i32
    %c0_i32_1 = arith.constant 0 : i32
    return %c0_i32, %c0_i32_0 : i32, i32
  }
  func.func @transform_5(%arg0: i32) -> (i32, i32) {
    %c0_i32 = arith.constant 0 : i32
    %c0_i32_0 = arith.constant 0 : i32
    return %arg0, %c0_i32 : i32, i32
  }
}

</mosaic_0001>

<bundles_post_ra>
// kernel: tpu_custom_call.1
= control target key start
LH: loop header
LB: loop body
LE: loop exit
PB: predicated region body
PF: predicated region fallthrough
CT: control target
= control target key end

     0   :  { %vm29_vm0 = vcmask 261120   ;;  %vm94_vm1 = vcmask 31744   ;;  %s205_s1 = inlined_call_operand.vmem [shape: f32[32,128], index: 1, kind: input, shape index: {}]   ;;  %s206_s3 = inlined_call_operand.vmem [shape: f32[128,4], index: 3, kind: input, shape index: {}]   ;;  %s207_s0 = inlined_call_operand.vmem [shape: f32[8,32], index: 0, kind: input, shape index: {}]   ;;  %s208_s2 = inlined_call_operand.vmem [shape: f32[1,128], index: 2, kind: input, shape index: {}]   ;;  %s209_s4 = inlined_call_operand.vmem [shape: f32[1,4], index: 4, kind: input, shape index: {}]   ;;  %s210_s5 = inlined_call_operand.vmem [shape: f32[8,4], index: 5, kind: output, shape index: {}]  }
   0x1   :  { %v24_v0 = vld [vmem:[%s205_s1 + $0x18] sm:$0xff]  ;;  %v23_v1 = vld [vmem:[%s205_s1 + $0x10] sm:$0xff]  ;;  %v22_v3 = vld [vmem:[%s205_s1 + $0x8] sm:$0xff] }
   0x2   :  { %45 = vmatpush.msra.mxu0 %v24_v0  ;;  %v69_v2 = vld [vmem:[%s206_s3 + $0x78] sm:$0xff]  ;;  %v68_v4 = vld [vmem:[%s206_s3 + $0x70] sm:$0xff]  ;;  %v67_v5 = vld [vmem:[%s206_s3 + $0x68] sm:$0xff] }
   0x3   :  { %74 = vmatpush.msra.mxu1 %v69_v2  ;;  %v21_v6 = vld [vmem:[%s205_s1] sm:$0xff]  ;;  %v65_v9 = vld [vmem:[%s206_s3 + $0x58] sm:$0xff]  ;;  %v64_v10 = vld [vmem:[%s206_s3 + $0x50] sm:$0xff] }
   0x4   :  { %46 = vmatpush.msra.mxu0 %v23_v1  ;;  %v20_v7 = vld [vmem:[%s207_s0] sm:$0xff]  ;;  %v63_v11 = vld [vmem:[%s206_s3 + $0x48] sm:$0xff]  ;;  %v61_v13 = vld [vmem:[%s206_s3 + $0x38] sm:$0xff] }
   0x5   :  { %75 = vmatpush.msra.mxu1 %v68_v4  ;;  %v66_v8 = vld [vmem:[%s206_s3 + $0x60] sm:$0xff]  ;;  %v60_v14 = vld [vmem:[%s206_s3 + $0x30] sm:$0xff]  ;;  %v59_v15 = vld [vmem:[%s206_s3 + $0x28] sm:$0xff] }
   0x6   :  { %47 = vmatpush.msra.mxu0 %v22_v3  ;;  %v62_v12 = vld [vmem:[%s206_s3 + $0x40] sm:$0xff]  ;;  %v57_v17 = vld [vmem:[%s206_s3 + $0x18] sm:$0xff]  ;;  %v56_v18 = vld [vmem:[%s206_s3 + $0x10] sm:$0xff] }
   0x7   :  { %76 = vmatpush.msra.mxu1 %v67_v5  ;;  %v58_v16 = vld [vmem:[%s206_s3 + $0x20] sm:$0xff]  ;;  %v55_v19 = vld [vmem:[%s206_s3 + $0x8] sm:$0xff] }
   0x8   :  { %48 = vmatpush.msra.mxu0 %v21_v6  ;;  %v54_v20 = vld [vmem:[%s206_s3] sm:$0xff] }
   0x9   :  { %100 = vmatmul.msk.f32.vlgmr.msra.gmra.mxu0 %vm29_vm0, %v20_v7  ;;  %77 = vmatpush.msra.mxu1 %v66_v8  ;;  %v101_v21 = vld [vmem:[%s208_s2] ss:$0 sm:$0xff] }
   0xa   :  { %v102_v25 = vld [vmem:[%s209_s4] ss:$0 sm:$0xff] }
   0xb   :  { %78 = vmatpush.msra.mxu1 %v65_v9 }
   0xd   :  { %79 = vmatpush.msra.mxu1 %v64_v10 }
   0xf   :  { %80 = vmatpush.msra.mxu1 %v63_v11 }
  0x11   :  { %81 = vmatpush.msra.mxu1 %v62_v12 }
  0x13   :  { %82 = vmatpush.msra.mxu1 %v61_v13 }
  0x15   :  { %83 = vmatpush.msra.mxu1 %v60_v14 }
  0x17   :  { %84 = vmatpush.msra.mxu1 %v59_v15 }
  0x19   :  { %85 = vmatpush.msra.mxu1 %v58_v16 }
  0x1b   :  { %86 = vmatpush.msra.mxu1 %v57_v17 }
  0x1d   :  { %87 = vmatpush.msra.mxu1 %v56_v18 }
  0x1f   :  { %88 = vmatpush.msra.mxu1 %v55_v19 }
  0x21   :  { %89 = vmatpush.msra.mxu1 %v54_v20 }
  0x86   :  { %v50_v22 = vpop.f32.mrf.mxu0 }
  0x87   :  { %v51_v23 = vadd.f32 %v101_v21, %v50_v22 }
  0x89   :  { %v53_v24 = vmax.f32 %v51_v23, 0.0 }
  0x8b   :  { %90 = vmatmul.f32.vlgmr.msra.gmra.mxu1 %v53_v24 }
 0x108   :  { %v91_v26 = vpop.f32.mrf.mxu1 }
 0x109   :  { %v92_v27 = vadd.f32 %v102_v25, %v91_v26 }
 0x10b   :  { %95 = vst.msk [vmem:[%s210_s5] sm:$0xff] %vm94_vm1, %v92_v27 }

</bundles_post_ra>
